<compile_context>
chip_gen: v7x
topology: tpu7x:2x2x1
jax: 0.10.0
libtpu: 0.0.40
codegen_flags: <defaults>
</compile_context>

<pallas_src>
import functools

import jax
import jax.numpy as jnp
from jax.experimental import pallas as pl
from jax.experimental.pallas import tpu as pltpu

_LANES = 128


def _model_kernel(w_ref, b_ref, x_ref, out_ref, *, batch, bpad):
    f32 = jnp.float32
    x = x_ref[...].astype(f32)                 # (4, Bpad): row 2*c + l holds x1[b, c, l]
    r0 = x[0:1, :]                             # x1[:, 0, 0]
    r1 = x[1:2, :]                             # x1[:, 0, 1]
    r2 = x[2:3, :]                             # x1[:, 1, 0]
    r3 = x[3:4, :]                             # x1[:, 1, 1]

    # torch.nn.Linear weight layout (out, in), flattened row-major in SMEM.
    w00 = w_ref[0]
    w01 = w_ref[1]
    w10 = w_ref[2]
    w11 = w_ref[3]
    b0 = b_ref[0]
    b1 = b_ref[1]

    # v3 = F.linear(x1.permute(0,2,1)).permute(0,2,1), i.e. v3[b,o,l] = W[o,:]@x1[b,:,l] + bias[o].
    # Scalar-from-SMEM * vector MADs; no MXU, no transposes.  Row = 2*o + l.
    v3_0 = w00 * r0 + w01 * r2 + b0            # (o=0, l=0)
    v3_1 = w00 * r1 + w01 * r3 + b0            # (o=0, l=1)
    v3_2 = w10 * r0 + w11 * r2 + b1            # (o=1, l=0)
    v3_3 = w10 * r1 + w11 * r3 + b1            # (o=1, l=1)
    # v2 = v3.permute(0,2,1) is the static row relabel [v3_0, v3_2, v3_1, v3_3].

    # torch.sum(x1, dim=1, keepdim=True): pairwise row add (VPU).
    s0 = r0 + r2                               # l = 0
    s1 = r1 + r3                               # l = 1

    # x2 = sum_c * v3 ** 2   (rows follow v3's (o, l) layout)
    x2_0 = s0 * v3_0 * v3_0
    x2_1 = s1 * v3_1 * v3_1
    x2_2 = s0 * v3_2 * v3_2
    x2_3 = s1 * v3_3 * v3_3

    # v4 = torch.max(x1, dim=-1, keepdim=True)[0]; v5 = v4 ** 2  (also reused as v9)
    v4_0 = jnp.maximum(r0, r1)                 # c = 0
    v4_1 = jnp.maximum(r2, r3)                 # c = 1
    v5_0 = v4_0 * v4_0
    v5_1 = v4_1 * v4_1

    # x3 = x2 ** 2 + v5 is computed by the torch model but never used -> skipped.

    # v6 = x2 ** 5 + torch.max(x2, dim=-1, keepdim=True)[0]
    mx0 = jnp.maximum(x2_0, x2_1)              # o = 0
    mx1 = jnp.maximum(x2_2, x2_3)              # o = 1

    def pow5(z):
        z2 = z * z
        return z2 * z2 * z

    v6_0 = pow5(x2_0) + mx0
    v6_1 = pow5(x2_1) + mx0
    v6_2 = pow5(x2_2) + mx1
    v6_3 = pow5(x2_3) + mx1

    # x2 <- v2 * x2 : positional elementwise product; v2's rows are v3's rows [0,2,1,3].
    x2n_0 = v3_0 * x2_0
    x2n_1 = v3_2 * x2_1
    x2n_2 = v3_1 * x2_2
    x2n_3 = v3_3 * x2_3

    # x4 = sqrt(x2 * v6)   (the one genuine sqrt per element)
    x4_0 = jnp.sqrt(x2n_0 * v6_0)
    x4_1 = jnp.sqrt(x2n_1 * v6_1)
    x4_2 = jnp.sqrt(x2n_2 * v6_2)
    x4_3 = jnp.sqrt(x2n_3 * v6_3)

    nan = jnp.float32(jnp.nan)

    def sqrt_sq(z):
        # sqrt(z) ** 2 without the EUP sqrt; keeps NaN-on-negative (and NaN passthrough).
        return jnp.where(z < 0, nan, z)

    # v7 = v5 * sqrt(x4 * v6) ** 2   (v5 broadcasts over the last dim)
    v7_0 = v5_0 * sqrt_sq(x4_0 * v6_0)
    v7_1 = v5_0 * sqrt_sq(x4_1 * v6_1)
    v7_2 = v5_1 * sqrt_sq(x4_2 * v6_2)
    v7_3 = v5_1 * sqrt_sq(x4_3 * v6_3)

    # softmax over the last dim: two row pairs, pairwise VPU max/add, EUP exp + reciprocal.
    m01 = jnp.maximum(v7_0, v7_1)
    e00 = jnp.exp(v7_0 - m01)
    e01 = jnp.exp(v7_1 - m01)
    d01 = e00 + e01
    m23 = jnp.maximum(v7_2, v7_3)
    e10 = jnp.exp(v7_2 - m23)
    e11 = jnp.exp(v7_3 - m23)
    d23 = e10 + e11
    # Per-batch sum of all softmax outputs (permute of v8 does not change the sum).
    v8_rowsum = d01 * pl.reciprocal(d01, approx=False) + d23 * pl.reciprocal(d23, approx=False)
    v4_rowsum = v4_0 + v4_1

    # Mask padded lanes out of the global cross-batch sums.
    if batch != bpad:
        lane = jax.lax.broadcasted_iota(jnp.int32, (1, bpad), 1)
        valid = (lane < batch).astype(f32)
        v8_rowsum = v8_rowsum * valid
        v4_rowsum = v4_rowsum * valid

    # x5 = torch.sum(v8) * torch.sum(v9)  -- the only cross-lane (XLU) reductions.
    x5 = jnp.sum(v8_rowsum) * jnp.sum(v4_rowsum)

    # return x5 + v7.permute(0, 2, 1): static row relabel [0, 2, 1, 3] + scalar splat.
    out = jnp.concatenate([v7_0, v7_2, v7_1, v7_3], axis=0) + x5
    out_ref[...] = out.astype(out_ref.dtype)


def model_forward(x, w, b):
    B, C, L = x.shape
    out_f, in_f = w.shape
    # The module's elementwise mixing of permuted tensors (v2 * x2, v5 broadcast)
    # only matches PyTorch when all these dims coincide (Linear(2, 2) on (B, 2, 2)).
    assert C == L == in_f == out_f == 2, "model requires C == L == in_features == out_features == 2"

    dtype = x.dtype
    # Layout plumbing: (B, 2, 2) -> (4, B) so batch rides the 128-lane axis.
    x_flat = jnp.transpose(x.reshape(B, C * L))                    # (4, B)
    bpad = max(_LANES, ((B + _LANES - 1) // _LANES) * _LANES)
    if bpad != B:
        x_flat = jnp.pad(x_flat, ((0, 0), (0, bpad - B)))          # zero-pad lanes

    w_flat = w.reshape(-1).astype(jnp.float32)                     # (4,) in SMEM
    b_flat = b.reshape(-1).astype(jnp.float32)                     # (2,) in SMEM

    kernel = functools.partial(_model_kernel, batch=B, bpad=bpad)

    out_flat = pl.pallas_call(
        kernel,
        out_shape=jax.ShapeDtypeStruct((C * L, bpad), dtype),
        grid_spec=pltpu.PrefetchScalarGridSpec(
            num_scalar_prefetch=0,
            grid=(1,),  # whole (lane-dense) batch in a single grid step
            in_specs=[
                pl.BlockSpec(memory_space=pltpu.MemorySpace.SMEM),   # weight (4,)
                pl.BlockSpec(memory_space=pltpu.MemorySpace.SMEM),   # bias   (2,)
                pl.BlockSpec((C * L, bpad), lambda i: (0, 0)),       # x      (4, Bpad)
            ],
            out_specs=pl.BlockSpec((C * L, bpad), lambda i: (0, 0)),
        ),
        compiler_params=pltpu.CompilerParams(
            dimension_semantics=("arbitrary",)),
    )(w_flat, b_flat, x_flat)

    # Undo the layout plumbing: (4, Bpad) -> (B, 2, 2).
    return jnp.transpose(out_flat[:, :B]).reshape(B, C, L)


def reference(x, w, b):
    """Pure-JAX mirror of the PyTorch forward for verification."""
    v1 = jnp.transpose(x, (0, 2, 1))
    v2 = v1 @ w.T + b
    v3 = jnp.transpose(v2, (0, 2, 1))
    x2 = jnp.sum(x, axis=1, keepdims=True) * v3 ** 2
    v4 = jnp.max(x, axis=-1, keepdims=True)
    v5 = v4 ** 2
    v6 = x2 ** 5 + jnp.max(x2, axis=-1, keepdims=True)
    x2 = v2 * x2
    x4 = jnp.sqrt(x2 * v6)
    v7 = v5 * jnp.sqrt(x4 * v6) ** 2
    v8 = jax.nn.softmax(v7, axis=-1)
    v9 = jnp.max(x, axis=-1, keepdims=True)
    x5 = jnp.sum(v8) * jnp.sum(v9)
    return x5 + jnp.transpose(v7, (0, 2, 1))


if __name__ == "__main__":
    key = jax.random.PRNGKey(0)
    kx, kw, kb = jax.random.split(key, 3)

    # x1 = torch.randn(1, 2, 2); Linear(2, 2) -> weight (2, 2), bias (2,)
    x1 = jax.random.normal(kx, (1, 2, 2), dtype=jnp.float32)
    w = jax.random.normal(kw, (2, 2), dtype=jnp.float32) * 0.5
    b = jax.random.normal(kb, (2,), dtype=jnp.float32) * 0.5

    out = jax.block_until_ready(model_forward(x1, w, b))
    ref = reference(x1, w, b)

    assert out.shape == (1, 2, 2)
    # sqrt of negative intermediates yields NaN in torch too; treat NaN == NaN.
    assert bool(jnp.allclose(out, ref, rtol=1e-5, atol=1e-5, equal_nan=True)), (
        f"mismatch:\n{out}\nvs\n{ref}")

    print("KERNEL_OK")
</pallas_src>

<mosaic_0001>
module attributes {stable_mosaic.version = 11 : i64} {
  func.func @_model_kernel(%arg0: i32, %arg1: memref<4xf32, #tpu.memory_space<smem>>, %arg2: memref<2xf32, #tpu.memory_space<smem>>, %arg3: memref<4x128xf32, #tpu.memory_space<vmem>>, %arg4: memref<4x128xf32, #tpu.memory_space<vmem>>) attributes {dimension_semantics = [#tpu.dimension_semantics<arbitrary>], iteration_bounds = array<i64: 1>, scalar_prefetch = 0 : i64, scratch_operands = 0 : i64, tpu.core_type = #tpu.core_type<tc>, window_params = [{transform_indices = @transform_0, window_bounds = array<i64: 4>}, {transform_indices = @transform_1, window_bounds = array<i64: 2>}, {pipeline_mode = #tpu.pipeline_mode<synchronous>, transform_indices = @transform_2, window_bounds = array<i64: 4, 128>}, {pipeline_mode = #tpu.pipeline_mode<synchronous>, transform_indices = @transform_3, window_bounds = array<i64: 4, 128>}]} {
    %c0 = arith.constant 0 : index
    %c0_0 = arith.constant 0 : index
    %0 = vector.load %arg3[%c0, %c0_0] : memref<4x128xf32, #tpu.memory_space<vmem>>, vector<4x128xf32>
    %1 = vector.extract_strided_slice %0 {offsets = [0, 0], sizes = [1, 128], strides = [1, 1]} : vector<4x128xf32> to vector<1x128xf32>
    %2 = vector.extract_strided_slice %0 {offsets = [1, 0], sizes = [1, 128], strides = [1, 1]} : vector<4x128xf32> to vector<1x128xf32>
    %3 = vector.extract_strided_slice %0 {offsets = [2, 0], sizes = [1, 128], strides = [1, 1]} : vector<4x128xf32> to vector<1x128xf32>
    %4 = vector.extract_strided_slice %0 {offsets = [3, 0], sizes = [1, 128], strides = [1, 1]} : vector<4x128xf32> to vector<1x128xf32>
    %c0_1 = arith.constant 0 : index
    %5 = memref.load %arg1[%c0_1] : memref<4xf32, #tpu.memory_space<smem>>
    %c1 = arith.constant 1 : index
    %6 = memref.load %arg1[%c1] : memref<4xf32, #tpu.memory_space<smem>>
    %c2 = arith.constant 2 : index
    %7 = memref.load %arg1[%c2] : memref<4xf32, #tpu.memory_space<smem>>
    %c3 = arith.constant 3 : index
    %8 = memref.load %arg1[%c3] : memref<4xf32, #tpu.memory_space<smem>>
    %c0_2 = arith.constant 0 : index
    %9 = memref.load %arg2[%c0_2] : memref<2xf32, #tpu.memory_space<smem>>
    %c1_3 = arith.constant 1 : index
    %10 = memref.load %arg2[%c1_3] : memref<2xf32, #tpu.memory_space<smem>>
    %11 = vector.broadcast %5 : f32 to vector<1x128xf32>
    %12 = arith.mulf %11, %1 : vector<1x128xf32>
    %13 = vector.broadcast %6 : f32 to vector<1x128xf32>
    %14 = arith.mulf %13, %3 : vector<1x128xf32>
    %15 = arith.addf %12, %14 : vector<1x128xf32>
    %16 = vector.broadcast %9 : f32 to vector<1x128xf32>
    %17 = arith.addf %15, %16 : vector<1x128xf32>
    %18 = vector.broadcast %5 : f32 to vector<1x128xf32>
    %19 = arith.mulf %18, %2 : vector<1x128xf32>
    %20 = vector.broadcast %6 : f32 to vector<1x128xf32>
    %21 = arith.mulf %20, %4 : vector<1x128xf32>
    %22 = arith.addf %19, %21 : vector<1x128xf32>
    %23 = vector.broadcast %9 : f32 to vector<1x128xf32>
    %24 = arith.addf %22, %23 : vector<1x128xf32>
    %25 = vector.broadcast %7 : f32 to vector<1x128xf32>
    %26 = arith.mulf %25, %1 : vector<1x128xf32>
    %27 = vector.broadcast %8 : f32 to vector<1x128xf32>
    %28 = arith.mulf %27, %3 : vector<1x128xf32>
    %29 = arith.addf %26, %28 : vector<1x128xf32>
    %30 = vector.broadcast %10 : f32 to vector<1x128xf32>
    %31 = arith.addf %29, %30 : vector<1x128xf32>
    %32 = vector.broadcast %7 : f32 to vector<1x128xf32>
    %33 = arith.mulf %32, %2 : vector<1x128xf32>
    %34 = vector.broadcast %8 : f32 to vector<1x128xf32>
    %35 = arith.mulf %34, %4 : vector<1x128xf32>
    %36 = arith.addf %33, %35 : vector<1x128xf32>
    %37 = vector.broadcast %10 : f32 to vector<1x128xf32>
    %38 = arith.addf %36, %37 : vector<1x128xf32>
    %39 = arith.addf %1, %3 : vector<1x128xf32>
    %40 = arith.addf %2, %4 : vector<1x128xf32>
    %41 = arith.mulf %39, %17 : vector<1x128xf32>
    %42 = arith.mulf %41, %17 : vector<1x128xf32>
    %43 = arith.mulf %40, %24 : vector<1x128xf32>
    %44 = arith.mulf %43, %24 : vector<1x128xf32>
    %45 = arith.mulf %39, %31 : vector<1x128xf32>
    %46 = arith.mulf %45, %31 : vector<1x128xf32>
    %47 = arith.mulf %40, %38 : vector<1x128xf32>
    %48 = arith.mulf %47, %38 : vector<1x128xf32>
    %49 = arith.maximumf %1, %2 : vector<1x128xf32>
    %50 = arith.maximumf %3, %4 : vector<1x128xf32>
    %51 = arith.mulf %49, %49 : vector<1x128xf32>
    %52 = arith.mulf %50, %50 : vector<1x128xf32>
    %53 = arith.maximumf %42, %44 : vector<1x128xf32>
    %54 = arith.maximumf %46, %48 : vector<1x128xf32>
    %55 = arith.mulf %42, %42 : vector<1x128xf32>
    %56 = arith.mulf %55, %55 : vector<1x128xf32>
    %57 = arith.mulf %56, %42 : vector<1x128xf32>
    %58 = arith.addf %57, %53 : vector<1x128xf32>
    %59 = arith.mulf %44, %44 : vector<1x128xf32>
    %60 = arith.mulf %59, %59 : vector<1x128xf32>
    %61 = arith.mulf %60, %44 : vector<1x128xf32>
    %62 = arith.addf %61, %53 : vector<1x128xf32>
    %63 = arith.mulf %46, %46 : vector<1x128xf32>
    %64 = arith.mulf %63, %63 : vector<1x128xf32>
    %65 = arith.mulf %64, %46 : vector<1x128xf32>
    %66 = arith.addf %65, %54 : vector<1x128xf32>
    %67 = arith.mulf %48, %48 : vector<1x128xf32>
    %68 = arith.mulf %67, %67 : vector<1x128xf32>
    %69 = arith.mulf %68, %48 : vector<1x128xf32>
    %70 = arith.addf %69, %54 : vector<1x128xf32>
    %71 = arith.mulf %17, %42 : vector<1x128xf32>
    %72 = arith.mulf %31, %44 : vector<1x128xf32>
    %73 = arith.mulf %24, %46 : vector<1x128xf32>
    %74 = arith.mulf %38, %48 : vector<1x128xf32>
    %75 = arith.mulf %71, %58 : vector<1x128xf32>
    %76 = math.sqrt %75 : vector<1x128xf32>
    %77 = arith.mulf %72, %62 : vector<1x128xf32>
    %78 = math.sqrt %77 : vector<1x128xf32>
    %79 = arith.mulf %73, %66 : vector<1x128xf32>
    %80 = math.sqrt %79 : vector<1x128xf32>
    %81 = arith.mulf %74, %70 : vector<1x128xf32>
    %82 = math.sqrt %81 : vector<1x128xf32>
    %83 = arith.mulf %76, %58 : vector<1x128xf32>
    %cst = arith.constant 0.000000e+00 : f32
    %84 = vector.broadcast %cst : f32 to vector<1x128xf32>
    %85 = arith.cmpf olt, %83, %84 : vector<1x128xf32>
    %cst_4 = arith.constant 0x7FC00000 : f32
    %86 = vector.broadcast %cst_4 : f32 to vector<1x128xf32>
    %87 = arith.select %85, %86, %83 : vector<1x128xi1>, vector<1x128xf32>
    %88 = arith.mulf %51, %87 : vector<1x128xf32>
    %89 = arith.mulf %78, %62 : vector<1x128xf32>
    %cst_5 = arith.constant 0.000000e+00 : f32
    %90 = vector.broadcast %cst_5 : f32 to vector<1x128xf32>
    %91 = arith.cmpf olt, %89, %90 : vector<1x128xf32>
    %cst_6 = arith.constant 0x7FC00000 : f32
    %92 = vector.broadcast %cst_6 : f32 to vector<1x128xf32>
    %93 = arith.select %91, %92, %89 : vector<1x128xi1>, vector<1x128xf32>
    %94 = arith.mulf %51, %93 : vector<1x128xf32>
    %95 = arith.mulf %80, %66 : vector<1x128xf32>
    %cst_7 = arith.constant 0.000000e+00 : f32
    %96 = vector.broadcast %cst_7 : f32 to vector<1x128xf32>
    %97 = arith.cmpf olt, %95, %96 : vector<1x128xf32>
    %cst_8 = arith.constant 0x7FC00000 : f32
    %98 = vector.broadcast %cst_8 : f32 to vector<1x128xf32>
    %99 = arith.select %97, %98, %95 : vector<1x128xi1>, vector<1x128xf32>
    %100 = arith.mulf %52, %99 : vector<1x128xf32>
    %101 = arith.mulf %82, %70 : vector<1x128xf32>
    %cst_9 = arith.constant 0.000000e+00 : f32
    %102 = vector.broadcast %cst_9 : f32 to vector<1x128xf32>
    %103 = arith.cmpf olt, %101, %102 : vector<1x128xf32>
    %cst_10 = arith.constant 0x7FC00000 : f32
    %104 = vector.broadcast %cst_10 : f32 to vector<1x128xf32>
    %105 = arith.select %103, %104, %101 : vector<1x128xi1>, vector<1x128xf32>
    %106 = arith.mulf %52, %105 : vector<1x128xf32>
    %107 = arith.maximumf %88, %94 : vector<1x128xf32>
    %108 = arith.subf %88, %107 : vector<1x128xf32>
    %109 = math.exp %108 : vector<1x128xf32>
    %110 = arith.subf %94, %107 : vector<1x128xf32>
    %111 = math.exp %110 : vector<1x128xf32>
    %112 = arith.addf %109, %111 : vector<1x128xf32>
    %113 = arith.maximumf %100, %106 : vector<1x128xf32>
    %114 = arith.subf %100, %113 : vector<1x128xf32>
    %115 = math.exp %114 : vector<1x128xf32>
    %116 = arith.subf %106, %113 : vector<1x128xf32>
    %117 = math.exp %116 : vector<1x128xf32>
    %118 = arith.addf %115, %117 : vector<1x128xf32>
    %119 = tpu.reciprocal %112 : vector<1x128xf32> -> vector<1x128xf32>
    %120 = arith.mulf %112, %119 : vector<1x128xf32>
    %121 = tpu.reciprocal %118 : vector<1x128xf32> -> vector<1x128xf32>
    %122 = arith.mulf %118, %121 : vector<1x128xf32>
    %123 = arith.addf %120, %122 : vector<1x128xf32>
    %124 = arith.addf %49, %50 : vector<1x128xf32>
    %125 = tpu.iota {dimensions = array<i32: 1>} : vector<1x128xi32>
    %c1_i32 = arith.constant 1 : i32
    %126 = vector.broadcast %c1_i32 : i32 to vector<1x128xi32>
    %127 = arith.cmpi slt, %125, %126 : vector<1x128xi32>
    %128 = arith.extui %127 : vector<1x128xi1> to vector<1x128xi32>
    %129 = arith.sitofp %128 : vector<1x128xi32> to vector<1x128xf32>
    %130 = arith.mulf %123, %129 : vector<1x128xf32>
    %131 = arith.mulf %124, %129 : vector<1x128xf32>
    %132 = vector.shape_cast %130 : vector<1x128xf32> to vector<1x1x128xf32>
    %cst_11 = arith.constant dense<0.000000e+00> : vector<1xf32>
    %133 = vector.multi_reduction <add>, %132, %cst_11 [1, 2] : vector<1x1x128xf32> to vector<1xf32>
    %134 = vector.shape_cast %133 : vector<1xf32> to vector<1x1x1xf32>
    %135 = vector.extract %134[0, 0, 0] : f32 from vector<1x1x1xf32>
    %136 = vector.shape_cast %131 : vector<1x128xf32> to vector<1x1x128xf32>
    %cst_12 = arith.constant dense<0.000000e+00> : vector<1xf32>
    %137 = vector.multi_reduction <add>, %136, %cst_12 [1, 2] : vector<1x1x128xf32> to vector<1xf32>
    %138 = vector.shape_cast %137 : vector<1xf32> to vector<1x1x1xf32>
    %139 = vector.extract %138[0, 0, 0] : f32 from vector<1x1x1xf32>
    %140 = arith.mulf %135, %139 : f32
    %141 = tpu.concatenate %88, %100, %94, %106 in 0 : vector<1x128xf32>, vector<1x128xf32>, vector<1x128xf32>, vector<1x128xf32> -> vector<4x128xf32>
    %142 = vector.broadcast %140 : f32 to vector<4x128xf32>
    %143 = arith.addf %141, %142 : vector<4x128xf32>
    %c0_13 = arith.constant 0 : index
    %c0_14 = arith.constant 0 : index
    %144 = vector.load %arg4[%c0_13, %c0_14] : memref<4x128xf32, #tpu.memory_space<vmem>>, vector<4x128xf32>
    tpu.vector_store %arg4[%c0_13, %c0_14], %143 {strides = array<i32>} : memref<4x128xf32, #tpu.memory_space<vmem>>, vector<4x128xf32>,
    return
  }
  func.func @transform_0(%arg0: i32) -> i32 {
    %c0_i32 = arith.constant 0 : i32
    %c0_i32_0 = arith.constant 0 : i32
    return %c0_i32 : i32
  }
  func.func @transform_1(%arg0: i32) -> i32 {
    %c0_i32 = arith.constant 0 : i32
    %c0_i32_0 = arith.constant 0 : i32
    return %c0_i32 : i32
  }
  func.func @transform_2(%arg0: i32) -> (i32, i32) {
    %c0_i32 = arith.constant 0 : i32
    %c0_i32_0 = arith.constant 0 : i32
    %c0_i32_1 = arith.constant 0 : i32
    return %c0_i32, %c0_i32_0 : i32, i32
  }
  func.func @transform_3(%arg0: i32) -> (i32, i32) {
    %c0_i32 = arith.constant 0 : i32
    %c0_i32_0 = arith.constant 0 : i32
    %c0_i32_1 = arith.constant 0 : i32
    return %c0_i32, %c0_i32_0 : i32, i32
  }
}

</mosaic_0001>

<bundles_post_ra>
// kernel: tpu_custom_call.1
= control target key start
LH: loop header
LB: loop body
LE: loop exit
PB: predicated region body
PF: predicated region fallthrough
CT: control target
= control target key end

     0   :  { %8 = vsyncpa [#allocation4], 0  ;;  %s424_s0 = inlined_call_operand.hbm [shape: f32[4], index: 0, kind: input, shape index: {}]   ;;  %s425_s1 = inlined_call_operand.vmem [shape: f32[2], index: 1, kind: input, shape index: {}]   ;;  %s426_s2 = inlined_call_operand.vmem [shape: f32[4,128], index: 2, kind: input, shape index: {}]   ;;  %s427_s3 = inlined_call_operand.hbm [shape: f32[4,128], index: 3, kind: output, shape index: {}]  }
   0x1   :  { %9 = vsyncpa [#allocation5], 0 }
   0x2   :  { %10 = vsyncpa [#allocation3], 0  ;;  %s25_s14 = sshll.u32 %s425_s1, 4  ;;  %s290_s17 = scalar_lea.hbm %s424_s0, 16  ;;  %s26_s14 = int_to_ptr.vmem [resolvable:$true] %s25_s14 }
   0x3   :  { %p291_p0 = scmp.ne.s32.totalorder %s424_s0, %s290_s17  ;;  %p294_p1 = scmp.lt.u32.totalorder %s290_s17, %s424_s0 }
   0x5   :  { %p296_p2 = pnand %p294_p1, %p291_p0 }
   0x7   :  { %299 = shalt.err (!%p296_p2)
}
   0x8   :  { %s340_s22 = smov [#allocation2]   ;;  %s300_s1 = scalar_lea.vmem %s26_s14, 16 }
   0x9   :  { %18 = dma.hbm_to_smem %s424_s0, 16, %s340_s22, [#allocation4]  }
   0xa   :  { %p301_p3 = scmp.ne.s32.totalorder %s26_s14, %s300_s1  ;;  %p305_p4 = scmp.lt.s32.totalorder %s26_s14, %s26_s14 }
   0xb   :  { %p306_p5 = scmp.lt.s32.totalorder %s300_s1, %s300_s1 }
   0xd   :  { %p307_p6 = por %p306_p5, %p305_p4 }
   0xf   :  { %p308_p7 = pnand %p307_p6, %p301_p3 }
  0x11   :  { %311 = shalt.err (!%p308_p7)
}
  0x12   :  { %s341_s25 = smov [#allocation6]  }
  0x13   :  { %28 = dma.vmem_to_smem %s26_s14, 16, %s341_s25, [#allocation5]  }
  0x14   :  { %334 = dma.done.wait [#allocation4], 16  }
  0x15   :  { %335 = vsyncadd [#allocation4], 4294967280 }
  0x16   :  { %336 = dma.done.wait [#allocation5], 16  }
  0x17   :  { %337 = vsyncadd [#allocation5], 4294967280 }
  0x18   :  { %37 = sfence }
  0x19   :  { %s39_s26 = sld [smem:[#allocation2]]  ;;  %s257_s27 = sld [smem:[#allocation2 + $0x1]]  ;;  %v382_v0 = vld [vmem:[%s426_s2] sm:$0xf]  ;;  %vm202_vm12 = vcmask 1040384   ;;  %vm234_vm14 = vcmask 1041408  }
  0x1a   :  { %s258_s28 = sld [smem:[#allocation2 + $0x2]]  ;;  %s259_s29 = sld [smem:[#allocation2 + $0x3]]  ;;  %v66_v9 = vrot.slane %v382_v0, 2  ;;  %v73_v50 = vrot.slane %v382_v0, 1  ;;  %vm236_vm15 = vcmask 1042432  }
  0x1b   :  { %s43_s0 = sld [smem:[#allocation6]]  ;;  %s260_s30 = sld [smem:[#allocation6 + $0x1]] }
  0x1c   :  { %v68_v16 = vadd.f32 %v66_v9, %v382_v0  ;;  %v392_v56 = vmax.f32 %v382_v0, %v73_v50  ;;  %v342_v50 = vmov 0.0   ;;  %s343_s8 = smov [#allocation7]  }
  0x1d   :  { %s247_s9 = sshll.u32 %s343_s8, 4  ;;  %s248_s9 = int_to_ptr.vmem [resolvable:$true] %s247_s9 }
  0x1e   :  { %s312_s10 = scalar_lea.vmem %s248_s9, 64  ;;  %p317_p9 = scmp.lt.s32.totalorder %s248_s9, %s248_s9 }
  0x1f   :  { %v45_v1 = vstv %s39_s26  ;;  %v47_v2 = vstv %s257_s27  ;;  %p313_p8 = scmp.ne.s32.totalorder %s248_s9, %s312_s10  ;;  %p318_p10 = scmp.lt.s32.totalorder %s312_s10, %s312_s10 }
  0x20   :  { %v46_v3 = vmul.f32 %v45_v1, %v382_v0  ;;  %v48_v4 = vmul.f32 %v47_v2, %v382_v0  ;;  %v55_v5 = vstv %s258_s28  ;;  %v57_v6 = vstv %s259_s29 }
  0x21   :  { %v56_v7 = vmul.f32 %v55_v5, %v382_v0  ;;  %v58_v8 = vmul.f32 %v57_v6, %v382_v0  ;;  %v53_v11 = vstv %s43_s0  ;;  %v63_v14 = vstv %s260_s30  ;;  %p319_p11 = por %p318_p10, %p317_p9 }
  0x22   :  { %v50_v10 = vrot.slane %v48_v4, 2 }
  0x23   :  { %v60_v12 = vrot.slane %v58_v8, 2  ;;  %p320_p12 = pnand %p319_p11, %p313_p8 }
  0x24   :  { %v52_v13 = vadd.f32 %v50_v10, %v46_v3 }
  0x25   :  { %v62_v15 = vadd.f32 %v60_v12, %v56_v7  ;;  %v76_v7 = vmul.f32 %v392_v56, %v392_v56 }
  0x26   :  { %v54_v17 = vadd.f32 %v53_v11, %v52_v13 }
  0x27   :  { %v64_v18 = vadd.f32 %v63_v14, %v62_v15 }
  0x28   :  { %v69_v19 = vmul.f32 %v68_v16, %v54_v17 }
  0x29   :  { %v71_v20 = vmul.f32 %v68_v16, %v64_v18 }
  0x2a   :  { %v70_v21 = vmul.f32 %v69_v19, %v54_v17 }
  0x2b   :  { %v72_v22 = vmul.f32 %v71_v20, %v64_v18 }
  0x2c   :  { %v78_v23 = vrot.slane %v70_v21, 1  ;;  %v85_v24 = vmul.f32 %v70_v21, %v70_v21  ;;  %v101_v34 = vmul.f32 %v70_v21, %v54_v17 }
  0x2d   :  { %v82_v25 = vrot.slane %v72_v22, 1  ;;  %v93_v26 = vmul.f32 %v72_v22, %v72_v22  ;;  %v103_v31 = vrot.slane %v72_v22, 7  ;;  %v106_v37 = vmul.f32 %v72_v22, %v64_v18 }
  0x2e   :  { %v80_v27 = vmax.f32 %v70_v21, %v78_v23  ;;  %v86_v28 = vmul.f32 %v85_v24, %v85_v24  ;;  %v102_v42 = vmul.f32 %v78_v23, %v64_v18 }
  0x2f   :  { %v84_v29 = vmax.f32 %v72_v22, %v82_v25  ;;  %v94_v30 = vmul.f32 %v93_v26, %v93_v26  ;;  %v105_v43 = vmul.f32 %v103_v31, %v54_v17 }
  0x30   :  { %v87_v32 = vmul.f32 %v86_v28, %v70_v21  ;;  %v90_v33 = vrot.slane %v80_v27, 7 }
  0x31   :  { %v95_v35 = vmul.f32 %v94_v30, %v72_v22  ;;  %v98_v36 = vrot.slane %v84_v29, 7 }
  0x32   :  { %v88_v38 = vadd.f32 %v87_v32, %v80_v27  ;;  %v92_v39 = vadd.f32 %v90_v33, %v87_v32 }
  0x33   :  { %v96_v40 = vadd.f32 %v95_v35, %v84_v29  ;;  %v100_v41 = vadd.f32 %v98_v36, %v95_v35 }
  0x34   :  { %v107_v44 = vmul.f32 %v101_v34, %v88_v38  ;;  %v116_v45 = vrot.slane %v92_v39, 1 }
  0x35   :  { %v127_v46 = vrot.slane %v96_v40, 7  ;;  %v137_v47 = vmul.f32 %v106_v37, %v100_v41 }
  0x36   :  { %270 = vrsqrt.f32 %v107_v44  ;;  %v118_v48 = vmul.f32 %v116_v45, %v102_v42  ;;  %vm110_vm0 = vcmp.eq.f32.partialorder %v107_v44, inf  ;;  %v113_v52 = vand.u32 2147483648, %v107_v44 }
  0x37   :  { %v129_v49 = vmul.f32 %v127_v46, %v105_v43  ;;  %272 = vrsqrt.f32 %v137_v47  ;;  %vm112_vm1 = vcmp.eq.f32.partialorder %v107_v44, 0.0  ;;  %vm140_vm2 = vcmp.eq.f32.partialorder %v137_v47, inf }
  0x38   :  { %274 = vrsqrt.f32 %v118_v48  ;;  %v143_v55 = vand.u32 2147483648, %v137_v47  ;;  %vm121_vm3 = vcmp.eq.f32.partialorder %v118_v48, inf  ;;  %vm142_vm4 = vcmp.eq.f32.partialorder %v137_v47, 0.0 }
  0x39   :  { %276 = vrsqrt.f32 %v129_v49  ;;  %vm123_vm5 = vcmp.eq.f32.partialorder %v118_v48, 0.0  ;;  %v124_v60 = vand.u32 2147483648, %v118_v48  ;;  %vm132_vm6 = vcmp.eq.f32.partialorder %v129_v49, inf }
  0x3a   :  { %v135_v1 = vand.u32 2147483648, %v129_v49  ;;  %vm134_vm7 = vcmp.eq.f32.partialorder %v129_v49, 0.0 }
  0x40   :  { %v271_v51 = vpop.eup %270 }
  0x41   :  { %v273_v53 = vpop.eup %272  ;;  %v109_v54 = vmul.f32 %v271_v51, %v107_v44 }
  0x42   :  { %v139_v57 = vmul.f32 %v273_v53, %v137_v47  ;;  %v275_v58 = vpop.eup %274 }
  0x43   :  { %v111_v59 = vsel %vm110_vm0, %v107_v44, %v109_v54  ;;  %v277_v61 = vpop.eup %276  ;;  %v120_v63 = vmul.f32 %v275_v58, %v118_v48  ;;  %v192_v44 = vrot.slane %v392_v56, 2 }
  0x44   :  { %v114_v62 = vsel %vm112_vm1, %v113_v52, %v111_v59  ;;  %v141_v2 = vsel %vm140_vm2, %v137_v47, %v139_v57  ;;  %v131_v3 = vmul.f32 %v277_v61, %v129_v49 }
  0x45   :  { %v144_v4 = vsel %vm142_vm4, %v143_v55, %v141_v2  ;;  %v145_v5 = vmul.f32 %v114_v62, %v88_v38  ;;  %v122_v0 = vsel %vm121_vm3, %v118_v48, %v120_v63 }
  0x46   :  { %v160_v6 = vmul.f32 %v144_v4, %v100_v41  ;;  %v125_v8 = vsel %vm123_vm5, %v124_v60, %v122_v0  ;;  %v133_v9 = vsel %vm132_vm6, %v129_v49, %v131_v3  ;;  %v195_v41 = vlaneseq }
  0x47   :  { %vm146_vm8 = vcmp.lt.f32.partialorder %v145_v5, 0.0  ;;  %v136_v10 = vsel %vm134_vm7, %v135_v1, %v133_v9  ;;  %v149_v12 = vmul.f32 %v125_v8, %v116_v45  ;;  %v194_v49 = vadd.f32 %v192_v44, %v392_v56 }
  0x48   :  { %v147_v11 = vsel %vm146_vm8, nan, %v145_v5  ;;  %vm161_vm9 = vcmp.lt.f32.partialorder %v160_v6, 0.0  ;;  %v153_v13 = vmul.f32 %v136_v10, %v127_v46  ;;  %v196_v42 = vand.u32 127, %v195_v41 }
  0x49   :  { %v162_v14 = vsel %vm161_vm9, nan, %v160_v6  ;;  %v148_v15 = vmul.f32 %v147_v11, %v76_v7  ;;  %vm150_vm10 = vcmp.lt.f32.partialorder %v149_v12, 0.0 }
  0x4a   :  { %v164_v16 = vrot.slane %v162_v14, 7  ;;  %v151_v17 = vsel %vm150_vm10, nan, %v149_v12  ;;  %vm154_vm11 = vcmp.lt.f32.partialorder %v153_v13, 0.0  ;;  %vm197_vm13 = vcmp.lt.s32.totalorder %v196_v42, 1 }
  0x4b   :  { %v397_v18 = vmul.f32 %v151_v17, %v76_v7  ;;  %v155_v19 = vsel %vm154_vm11, nan, %v153_v13  ;;  %v261_v51 = vsel %vm197_vm13, 1.0, %v342_v50 }
  0x4c   :  { %v157_v20 = vrot.slane %v155_v19, 7  ;;  %v399_v21 = vmul.f32 %v164_v16, %v76_v7  ;;  %v201_v54 = vmul.f32 %v261_v51, %v194_v49 }
  0x4d   :  { %v167_v22 = vmax.f32 %v148_v15, %v397_v18 }
  0x4e   :  { %v159_v23 = vmul.f32 %v157_v20, %v76_v7  ;;  %v213_v57 = vsel %vm202_vm12, %v201_v54, 0.0  ;;  %v228_v7 = vrot.slane %v397_v18, 6  ;;  %v231_v8 = vrot.slane %v399_v21, 7 }
  0x4f   :  { %v168_v24 = vsub.f32 %v148_v15, %v167_v22  ;;  %v171_v25 = vsub.f32 %v397_v18, %v167_v22 }
  0x50   :  { %v175_v26 = vmax.f32 %v159_v23, %v399_v21  ;;  %v225_v27 = vrot.slane %v159_v23, 1 }
  0x51   :  { %v169_v28 = vmul.f32 1.442695, %v168_v24  ;;  %v172_v29 = vmul.f32 1.442695, %v171_v25 }
  0x52   :  { %v176_v30 = vsub.f32 %v159_v23, %v175_v26  ;;  %v179_v31 = vsub.f32 %v399_v21, %v175_v26  ;;  %v233_v32 = vsel %vm202_vm12, %v148_v15, %v225_v27 }
  0x53   :  { %278 = vpow2.f32 %v169_v28  ;;  %v235_v9 = vsel %vm234_vm14, %v233_v32, %v228_v7 }
  0x54   :  { %280 = vpow2.f32 %v172_v29  ;;  %v177_v33 = vmul.f32 1.442695, %v176_v30  ;;  %v180_v34 = vmul.f32 1.442695, %v179_v31  ;;  %v237_v10 = vsel %vm236_vm15, %v235_v9, %v231_v8 }
  0x56   :  { %282 = vpow2.f32 %v177_v33 }
  0x57   :  { %284 = vpow2.f32 %v180_v34 }
  0x5d   :  { %v279_v35 = vpop.eup %278 }
  0x5e   :  { %v281_v36 = vpop.eup %280 }
  0x5f   :  { %v174_v37 = vadd.f32 %v281_v36, %v279_v35 }
  0x60   :  { %v283_v38 = vpop.eup %282 }
  0x61   :  { %v285_v39 = vpop.eup %284  ;;  %286 = vrcp.f32 %v174_v37 }
  0x62   :  { %v182_v40 = vadd.f32 %v285_v39, %v283_v38 }
  0x64   :  { %288 = vrcp.f32 %v182_v40 }
  0x6b   :  { %v287_v43 = vpop.eup %286 }
  0x6c   :  { %v184_v46 = vmul.f32 %v287_v43, %v174_v37 }
  0x6e   :  { %v289_v45 = vpop.eup %288 }
  0x6f   :  { %v186_v47 = vmul.f32 %v289_v45, %v182_v40 }
  0x71   :  { %v188_v48 = vrot.slane %v186_v47, 2 }
  0x73   :  { %v190_v52 = vadd.f32 %v188_v48, %v184_v46 }
  0x75   :  { %v200_v53 = vmul.f32 %v261_v51, %v190_v52 }
  0x77   :  { %v203_v55 = vsel %vm202_vm12, %v200_v53, 0.0 }
  0x78   :  { %204 = vadd.xlane.f32.xlu0 %v203_v55 }
  0x7c   :  { %214 = vadd.xlane.f32.xlu0 %v213_v57 }
 0x105   :  { %v205_v58 = vpop.xlane.xlu0 %204 }
 0x106   :  { %v206_v59 = vrot.slane %v205_v58, 4 }
 0x108   :  { %v207_v60 = vadd.f32 %v206_v59, %v205_v58 }
 0x109   :  { %v215_v61 = vpop.xlane.xlu0 %214 }
 0x10a   :  { %v208_v62 = vrot.slane %v207_v60, 2  ;;  %v216_v63 = vrot.slane %v215_v61, 4 }
 0x10c   :  { %v217_v1 = vadd.f32 %v216_v63, %v215_v61  ;;  %v209_v2 = vadd.f32 %v208_v62, %v207_v60 }
 0x10e   :  { %v218_v56 = vrot.slane %v217_v1, 2  ;;  %v210_v3 = vrot.slane %v209_v2, 1 }
 0x110   :  { %v219_v4 = vadd.f32 %v218_v56, %v217_v1  ;;  %v211_v5 = vadd.f32 %v210_v3, %v209_v2 }
 0x112   :  { %262 = vpush %v211_v5  ;;  %v220_v0 = vrot.slane %v219_v4, 1 }
 0x114   :  { %v221_v6 = vadd.f32 %v220_v0, %v219_v4 }
 0x116   :  { %264 = vpush %v221_v6 }
 0x143   :  { %s263_s2 = spop %262 }
 0x147   :  { %s265_s6 = spop %264 }
 0x148   :  { %s223_s7 = smul.f32 %s265_s6, %s263_s2 }
 0x14a   :  { %v238_v11 = vstv %s223_s7 }
 0x14b   :  { %v239_v12 = vadd.f32 %v238_v11, %v237_v10 }
 0x14d   :  { %240 = vst [vmem:[#allocation7] sm:$0xf] %v239_v12 }
 0x14e   :  { %323 = shalt.err (!%p320_p12)
}
 0x14f   :  { %s324_s13 = scalar_lea.hbm %s427_s3, 64 }
 0x150   :  { %p325_p13 = scmp.ne.s32.totalorder %s427_s3, %s324_s13  ;;  %p328_p0 = scmp.lt.u32.totalorder %s324_s13, %s427_s3 }
 0x152   :  { %p330_p1 = pnand %p328_p0, %p325_p13 }
 0x154   :  { %333 = shalt.err (!%p330_p1)
}
 0x155   :  { %250 = dma.vmem_to_hbm [thread:$0]  %s248_s9, 64, %s427_s3, [#allocation3]  }
 0x156   :  { %338 = dma.done.wait [#allocation3], 64  }
 0x157   :  { %339 = vsyncadd [#allocation3], 4294967232 }
 0x158   :  { %254 = vsyncpa [#allocation3], 1 }
 0x159   :  { %255 = vsyncpa [#allocation4], 1 }
 0x15a   :  { %256 = vsyncpa [#allocation5], 1 }

</bundles_post_ra>
